<compile_context>
chip_gen: v6e
topology: v6e:2x2x1
jax: 0.10.0
libtpu: 0.0.40
codegen_flags: <defaults>
</compile_context>

<pallas_src>
import functools

import jax
import jax.numpy as jnp
from jax.experimental import pallas as pl
from jax.experimental.pallas import tpu as pltpu


def _round_up(x: int, m: int) -> int:
    return ((x + m - 1) // m) * m


def _cdiv(a: int, b: int) -> int:
    return -(-a // b)


def _vmem_capacity_bytes() -> int:
    """Per-TensorCore VMEM capacity; conservative fallback = v7x (64 MiB)."""
    try:
        info = pltpu.get_tpu_info()
        cap = getattr(info, "vmem_capacity_bytes", None)
        if cap:
            return int(cap)
    except Exception:
        pass
    return 64 * 1024 * 1024


def _pick_tile(dim: int, target: int, mult: int) -> int:
    """Largest tile <= target (multiple of `mult`) that minimizes padding."""
    if dim <= target:
        return dim
    n_blocks = _cdiv(dim, target)
    return _round_up(_cdiv(dim, n_blocks), mult)


# --------------------------------------------------------------------------
# Kernels
# --------------------------------------------------------------------------
def _linear_kernel_acc(x_ref, w_ref, b_ref, o_ref, acc_ref, *, compute_dtype):
    """3-D grid (M, N, K): accumulate over K, add bias + store on last step."""
    k = pl.program_id(2)

    @pl.when(k == 0)
    def _():
        acc_ref[...] = jnp.zeros_like(acc_ref)

    acc_ref[...] += jnp.dot(
        x_ref[...].astype(compute_dtype),
        w_ref[...].astype(compute_dtype),
        preferred_element_type=jnp.float32,
    )

    @pl.when(k == pl.num_programs(2) - 1)
    def _():
        out = acc_ref[...] + b_ref[...].astype(jnp.float32)
        o_ref[...] = out.astype(o_ref.dtype)


def _linear_kernel_single(x_ref, w_ref, b_ref, o_ref, *, compute_dtype):
    """2-D grid (M, N): whole K in one tile — no scratch accumulator."""
    acc = jnp.dot(
        x_ref[...].astype(compute_dtype),
        w_ref[...].astype(compute_dtype),
        preferred_element_type=jnp.float32,
    )
    o_ref[...] = (acc + b_ref[...].astype(jnp.float32)).astype(o_ref.dtype)


# --------------------------------------------------------------------------
# Wrapper
# --------------------------------------------------------------------------
@functools.partial(jax.jit, static_argnames=("compute_dtype", "tm", "tn", "tk"))
def linear_forward(x, w, b, *, compute_dtype=jnp.bfloat16, tm=None, tn=None, tk=None):
    """y = x @ w + b via a tiled Pallas TPU kernel.

    compute_dtype: MXU operand dtype (default bf16, f32 accumulation). Inputs
    are cast per-tile inside the kernel, so no extra HBM pass is introduced.
    tm/tn/tk: optional static tile overrides (must respect (8,128) alignment).
    """
    M, K = x.shape
    K2, N = w.shape
    assert K == K2 and b.shape == (1, N)
    out_dtype = x.dtype
    compute_dtype = jnp.dtype(compute_dtype) if compute_dtype is not None else jnp.dtype(x.dtype)

    x_isz = jnp.dtype(x.dtype).itemsize
    w_isz = jnp.dtype(w.dtype).itemsize
    b_isz = jnp.dtype(b.dtype).itemsize
    out_isz = jnp.dtype(out_dtype).itemsize

    # ---- hardware-aware VMEM budget (~46 MiB v7x, ~92 MiB v5e/v6e) -------
    vmem_cap = _vmem_capacity_bytes()
    budget = int(0.72 * vmem_cap)

    # ---- alignment: bf16 packs 2 rows/sublane -> 16-row M granularity ----
    m_align = 16 if compute_dtype.itemsize < 4 else 8
    Mp = _round_up(M, m_align)
    Np = _round_up(N, 128)
    Kp = _round_up(K, 128)
    n_mult = 256 if Np >= 256 else 128   # 2x256^2 MXU on v6e/v7x
    k_mult = 256 if Kp >= 256 else 128

    # ---- tile selection ---------------------------------------------------
    # Collapse M for modest batch sizes so W is streamed from HBM only once.
    tk_target = 2048 if x_isz <= 2 else 1024
    user_tk = tk is not None
    tm = tm if tm is not None else _pick_tile(Mp, 1024, m_align)
    tn = tn if tn is not None else _pick_tile(Np, 512, n_mult)
    tk = tk if tk is not None else _pick_tile(Kp, tk_target, k_mult)

    def _footprint(tm_, tn_, tk_, w_bufs_, with_acc):
        return (2 * tm_ * tk_ * x_isz            # x, double-buffered
                + w_bufs_ * tk_ * tn_ * w_isz    # w, multi-buffered
                + 2 * tn_ * b_isz                # bias
                + 2 * tm_ * tn_ * out_isz        # output
                + (tm_ * tn_ * 4 if with_acc else 0))  # f32 accumulator

    if not user_tk:
        while _footprint(tm, tn, tk, 2, True) > budget and tk > k_mult:
            tk = _round_up(tk // 2, k_mult)

    Mp = _round_up(Mp, tm)
    Np = _round_up(Np, tn)
    Kp = _round_up(Kp, tk)

    # Keep both TensorCores busy on v7x: if M and N both collapsed to a single
    # block, split N in two (W HBM traffic is unchanged; x is tiny).
    if Mp // tm == 1 and Np // tn == 1 and Np >= 2 * n_mult:
        tn = _round_up(_cdiv(Np, 2), n_mult)
        Np = _round_up(Np, tn)

    nm, nn, nk = Mp // tm, Np // tn, Kp // tk

    # Triple-buffer the streamed W operand when there are enough K steps.
    w_bufs = 3 if (nk >= 3 and _footprint(tm, tn, tk, 3, True) <= budget) else 2

    # ---- zero-pad to tile multiples (exact for matmul) ---------------------
    if (Mp, Kp) != (M, K):
        x = jnp.pad(x, ((0, Mp - M), (0, Kp - K)))
    if (Kp, Np) != (K, N):
        w = jnp.pad(w, ((0, Kp - K), (0, Np - N)))
    if Np != N:
        b = jnp.pad(b, ((0, 0), (0, Np - N)))

    need = _footprint(tm, tn, tk, w_bufs, nk > 1)
    vmem_limit = int(min(vmem_cap, max(need + (16 << 20), 32 << 20)))

    cost = pl.CostEstimate(
        flops=2 * Mp * Np * Kp,
        transcendentals=0,
        bytes_accessed=(nn * Mp * Kp * x_isz + nm * Kp * Np * w_isz
                        + nm * nn * Np * b_isz + Mp * Np * out_isz),
    )

    if nk > 1:
        w_map = lambda i, j, k: (k, j)   # independent of M -> W not re-fetched per i
        if w_bufs != 2:
            try:
                w_spec = pl.BlockSpec((tk, tn), w_map, pipeline_mode=pl.Buffered(w_bufs))
            except TypeError:
                w_spec = pl.BlockSpec((tk, tn), w_map)
        else:
            w_spec = pl.BlockSpec((tk, tn), w_map)

        out_padded = pl.pallas_call(
            functools.partial(_linear_kernel_acc, compute_dtype=compute_dtype),
            out_shape=jax.ShapeDtypeStruct((Mp, Np), out_dtype),
            grid_spec=pltpu.PrefetchScalarGridSpec(
                num_scalar_prefetch=0,
                grid=(nm, nn, nk),
                in_specs=[
                    pl.BlockSpec((tm, tk), lambda i, j, k: (i, k)),
                    w_spec,
                    pl.BlockSpec((1, tn), lambda i, j, k: (0, j)),  # resident over K
                ],
                out_specs=pl.BlockSpec((tm, tn), lambda i, j, k: (i, j)),
                scratch_shapes=[pltpu.VMEM((tm, tn), jnp.float32)],
            ),
            compiler_params=pltpu.CompilerParams(
                dimension_semantics=("parallel", "parallel", "arbitrary"),
                vmem_limit_bytes=vmem_limit,
            ),
            cost_estimate=cost,
        )(x, w, b)
    else:
        # Single K step: write dot + bias directly, no scratch accumulator.
        out_padded = pl.pallas_call(
            functools.partial(_linear_kernel_single, compute_dtype=compute_dtype),
            out_shape=jax.ShapeDtypeStruct((Mp, Np), out_dtype),
            grid_spec=pltpu.PrefetchScalarGridSpec(
                num_scalar_prefetch=0,
                grid=(nm, nn),
                in_specs=[
                    pl.BlockSpec((tm, Kp), lambda i, j: (i, 0)),
                    pl.BlockSpec((Kp, tn), lambda i, j: (0, j)),
                    pl.BlockSpec((1, tn), lambda i, j: (0, j)),
                ],
                out_specs=pl.BlockSpec((tm, tn), lambda i, j: (i, j)),
            ),
            compiler_params=pltpu.CompilerParams(
                dimension_semantics=("parallel", "parallel"),
                vmem_limit_bytes=vmem_limit,
            ),
            cost_estimate=cost,
        )(x, w, b)

    return out_padded[:M, :N]


if __name__ == "__main__":
    key = jax.random.PRNGKey(0)
    kx, kw, kb, kx2, kw2, kb2 = jax.random.split(key, 6)

    # --- Shape matching the module: Linear(32, 128), batch 8 ----------------
    batch, in_features, out_features = 8, 32, 128
    x = jax.random.normal(kx, (batch, in_features), dtype=jnp.float32)
    W = jax.random.normal(kw, (in_features, out_features), dtype=jnp.float32)
    B = jax.random.normal(kb, (1, out_features), dtype=jnp.float32)

    # Default (bf16 MXU compute, f32 accumulation) path.
    y = jax.block_until_ready(linear_forward(x, W, B))
    y_ref_bf16 = jnp.dot(x.astype(jnp.bfloat16), W.astype(jnp.bfloat16),
                         preferred_element_type=jnp.float32) + B
    assert y.shape == (batch, out_features)
    assert jnp.allclose(y, y_ref_bf16, atol=2e-2, rtol=2e-2)

    # Full f32 path matches the exact reference.
    y32 = jax.block_until_ready(linear_forward(x, W, B, compute_dtype=jnp.float32))
    assert jnp.allclose(y32, x @ W + B, atol=1e-4, rtol=1e-4)

    # --- Multi-block sanity check: forced small tiles -> grid (1, 2, 4),
    #     exercising K accumulation, gated bias add and Buffered(3) W stream.
    M2, K2, N2 = 16, 512, 512
    x2 = jax.random.normal(kx2, (M2, K2), dtype=jnp.float32)
    W2 = jax.random.normal(kw2, (K2, N2), dtype=jnp.float32)
    B2 = jax.random.normal(kb2, (1, N2), dtype=jnp.float32)

    y2 = jax.block_until_ready(
        linear_forward(x2, W2, B2, tm=16, tn=256, tk=128)
    )
    y2_ref = jnp.dot(x2.astype(jnp.bfloat16), W2.astype(jnp.bfloat16),
                     preferred_element_type=jnp.float32) + B2
    assert y2.shape == (M2, N2)
    assert jnp.allclose(y2, y2_ref, atol=5e-2, rtol=2e-2)

    print("KERNEL_OK")
</pallas_src>

<mosaic_0001>
module attributes {stable_mosaic.version = 11 : i64} {
  func.func @_linear_kernel_single(%arg0: i32, %arg1: i32, %arg2: memref<16x128xf32, #tpu.memory_space<vmem>>, %arg3: memref<128x128xf32, #tpu.memory_space<vmem>>, %arg4: memref<1x128xf32, #tpu.memory_space<vmem>>, %arg5: memref<16x128xf32, #tpu.memory_space<vmem>>) attributes {dimension_semantics = [#tpu.dimension_semantics<parallel>, #tpu.dimension_semantics<parallel>], iteration_bounds = array<i64: 1, 1>, scalar_prefetch = 0 : i64, scratch_operands = 0 : i64, tpu.core_type = #tpu.core_type<tc>, window_params = [{transform_indices = @transform_0, window_bounds = array<i64: 16, 128>}, {transform_indices = @transform_1, window_bounds = array<i64: 128, 128>}, {transform_indices = @transform_2, window_bounds = array<i64: 1, 128>}, {transform_indices = @transform_3, window_bounds = array<i64: 16, 128>}]} {
    %c0 = arith.constant 0 : index
    %c0_0 = arith.constant 0 : index
    %0 = vector.load %arg2[%c0, %c0_0] : memref<16x128xf32, #tpu.memory_space<vmem>>, vector<16x128xf32>
    %1 = arith.truncf %0 : vector<16x128xf32> to vector<16x128xbf16>
    %c0_1 = arith.constant 0 : index
    %c0_2 = arith.constant 0 : index
    %2 = vector.load %arg3[%c0_1, %c0_2] : memref<128x128xf32, #tpu.memory_space<vmem>>, vector<128x128xf32>
    %3 = arith.truncf %2 : vector<128x128xf32> to vector<128x128xbf16>
    %cst = arith.constant dense<0.000000e+00> : vector<16x128xf32>
    %4 = tpu.matmul %1, %3, %cst {dimension_numbers = #tpu.dot_dimension_numbers<[1], [0], [0], [1], [0, 0, 1, 1], [], []>} : vector<16x128xbf16>, vector<128x128xbf16>, vector<16x128xf32> -> vector<16x128xf32>
    %c0_3 = arith.constant 0 : index
    %c0_4 = arith.constant 0 : index
    %5 = vector.load %arg4[%c0_3, %c0_4] : memref<1x128xf32, #tpu.memory_space<vmem>>, vector<1x128xf32>
    %6 = vector.broadcast %5 : vector<1x128xf32> to vector<16x128xf32>
    %7 = arith.addf %4, %6 : vector<16x128xf32>
    %c0_5 = arith.constant 0 : index
    %c0_6 = arith.constant 0 : index
    %8 = vector.load %arg5[%c0_5, %c0_6] : memref<16x128xf32, #tpu.memory_space<vmem>>, vector<16x128xf32>
    tpu.vector_store %arg5[%c0_5, %c0_6], %7 {strides = array<i32>} : memref<16x128xf32, #tpu.memory_space<vmem>>, vector<16x128xf32>,
    return
  }
  func.func @transform_0(%arg0: i32, %arg1: i32) -> (i32, i32) {
    %c0_i32 = arith.constant 0 : i32
    %c0_i32_0 = arith.constant 0 : i32
    return %arg0, %c0_i32 : i32, i32
  }
  func.func @transform_1(%arg0: i32, %arg1: i32) -> (i32, i32) {
    %c0_i32 = arith.constant 0 : i32
    %c0_i32_0 = arith.constant 0 : i32
    return %c0_i32, %arg1 : i32, i32
  }
  func.func @transform_2(%arg0: i32, %arg1: i32) -> (i32, i32) {
    %c0_i32 = arith.constant 0 : i32
    %c0_i32_0 = arith.constant 0 : i32
    return %c0_i32, %arg1 : i32, i32
  }
  func.func @transform_3(%arg0: i32, %arg1: i32) -> (i32, i32) {
    %c0_i32 = arith.constant 0 : i32
    return %arg0, %arg1 : i32, i32
  }
}

</mosaic_0001>

<bundles_post_ra>
// kernel: linear_forward.1
= control target key start
LH: loop header
LB: loop body
LE: loop exit
PB: predicated region body
PF: predicated region fallthrough
CT: control target
= control target key end

     0   :  { %v128_v0 = vmov 0.0   ;;  %vm129_vm0 = vmmov 0   ;;  %s213_s1 = inlined_call_operand.vmem [shape: f32[128,128], index: 1, kind: input, shape index: {}]   ;;  %s214_s0 = inlined_call_operand.vmem [shape: f32[16,128], index: 0, kind: input, shape index: {}]   ;;  %s215_s2 = inlined_call_operand.vmem [shape: f32[1,128], index: 2, kind: input, shape index: {}]   ;;  %s216_s3 = inlined_call_operand.vmem [shape: f32[16,128], index: 3, kind: output, shape index: {}]  }
   0x1   :  { %106 = vmatprep.subr.bf16.mxu0 %v128_v0  ;;  %v32_v1 = vld [vmem:[%s213_s1 + $0x70] sm:$0xff]  ;;  %v33_v2 = vld [vmem:[%s213_s1 + $0x78] sm:$0xff]  ;;  %v30_v3 = vld [vmem:[%s213_s1 + $0x60] sm:$0xff]  ;;  %122 = vmatprep.mubr.msk.bf16.mxu0 %vm129_vm0, %v128_v0 }
   0x2   :  { %v41_v4 = vpack.c.bf16 %v33_v2, %v32_v1  ;;  %v31_v5 = vld [vmem:[%s213_s1 + $0x68] sm:$0xff]  ;;  %v28_v7 = vld [vmem:[%s213_s1 + $0x50] sm:$0xff]  ;;  %v29_v8 = vld [vmem:[%s213_s1 + $0x58] sm:$0xff] }
   0x3   :  { %v40_v6 = vpack.c.bf16 %v31_v5, %v30_v3  ;;  %v39_v9 = vpack.c.bf16 %v29_v8, %v28_v7  ;;  %v26_v10 = vld [vmem:[%s213_s1 + $0x40] sm:$0xff]  ;;  %v27_v11 = vld [vmem:[%s213_s1 + $0x48] sm:$0xff]  ;;  %v24_v13 = vld [vmem:[%s213_s1 + $0x30] sm:$0xff] }
   0x4   :  { %107 = vmatpush3.bf16.msra.mxu0 %v41_v4  ;;  %v38_v12 = vpack.c.bf16 %v27_v11, %v26_v10  ;;  %v25_v14 = vld [vmem:[%s213_s1 + $0x38] sm:$0xff]  ;;  %v22_v16 = vld [vmem:[%s213_s1 + $0x20] sm:$0xff]  ;;  %v23_v17 = vld [vmem:[%s213_s1 + $0x28] sm:$0xff] }
   0x5   :  { %108 = vmatprep.subr.bf16.mxu0 %v128_v0  ;;  %v37_v15 = vpack.c.bf16 %v25_v14, %v24_v13  ;;  %v36_v18 = vpack.c.bf16 %v23_v17, %v22_v16  ;;  %v20_v19 = vld [vmem:[%s213_s1 + $0x10] sm:$0xff]  ;;  %v21_v20 = vld [vmem:[%s213_s1 + $0x18] sm:$0xff]  ;;  %v18_v22 = vld [vmem:[%s213_s1] sm:$0xff] }
   0x6   :  { %v35_v21 = vpack.c.bf16 %v21_v20, %v20_v19  ;;  %v19_v23 = vld [vmem:[%s213_s1 + $0x8] sm:$0xff]  ;;  %v15_v25 = vld [vmem:[%s214_s0] sm:$0xff] }
   0x7   :  { %v34_v24 = vpack.c.bf16 %v19_v23, %v18_v22  ;;  %v16_v26 = vld [vmem:[%s214_s0 + $0x8] sm:$0xff]  ;;  %v96_v28 = vld [vmem:[%s215_s2] ss:$0 sm:$0xff] }
   0x8   :  { %109 = vmatpush3.bf16.msra.mxu0 %v40_v6  ;;  %v17_v27 = vpack.c.bf16 %v16_v26, %v15_v25 }
   0x9   :  { %110 = vmatprep.subr.bf16.mxu0 %v128_v0 }
   0xc   :  { %111 = vmatpush3.bf16.msra.mxu0 %v39_v9 }
   0xd   :  { %112 = vmatprep.subr.bf16.mxu0 %v128_v0 }
  0x10   :  { %113 = vmatpush3.bf16.msra.mxu0 %v38_v12 }
  0x11   :  { %114 = vmatprep.subr.bf16.mxu0 %v128_v0 }
  0x14   :  { %115 = vmatpush3.bf16.msra.mxu0 %v37_v15 }
  0x15   :  { %116 = vmatprep.subr.bf16.mxu0 %v128_v0 }
  0x18   :  { %117 = vmatpush3.bf16.msra.mxu0 %v36_v18 }
  0x19   :  { %118 = vmatprep.subr.bf16.mxu0 %v128_v0 }
  0x1c   :  { %119 = vmatpush3.bf16.msra.mxu0 %v35_v21 }
  0x1d   :  { %120 = vmatprep.subr.bf16.mxu0 %v128_v0 }
  0x20   :  { %121 = vmatpush3.bf16.msra.mxu0 %v34_v24 }
  0x23   :  { %123 = vmatmul.mubr.bf16.vlgmr.msra.gmra.mxu0 %v17_v27 }
  0xe3   :  { %v83_v29 = vpop.f32.mrf.mxu0 }
  0xe4   :  { %v84_v30 = vadd.f32 %v96_v28, %v83_v29 }
  0xe5   :  { %v124_v31 = vpop.f32.mrf.mxu0 }
  0xe6   :  { %90 = vst [vmem:[%s216_s3] sm:$0xff] %v84_v30 }
  0xe7   :  { %v86_v32 = vpop.f32.mrf.mxu0 }
  0xe8   :  { %v87_v33 = vadd.f32 %v96_v28, %v86_v32 }
  0xe9   :  { %v125_v34 = vpop.f32.mrf.mxu0 }
  0xea   :  { %91 = vst [vmem:[%s216_s3 + $0x8] sm:$0xff] %v87_v33 }

</bundles_post_ra>
